<compile_context>
chip_gen: v7x
topology: tpu7x:2x2x1
jax: 0.10.0
libtpu: 0.0.40
codegen_flags: <defaults>
</compile_context>

<pallas_src>
import functools

import jax
import jax.numpy as jnp
from jax import lax
from jax.experimental import pallas as pl
from jax.experimental.pallas import tpu as pltpu


def _round_up(x: int, m: int) -> int:
    return (x + m - 1) // m * m


def _gather_kernel(ids_ref, w_hbm, o_ref, sem, *, vocab_start, vp, tok_block):
    """One token tile: DMA-gather tok_block embedding rows from HBM into the output tile."""
    t = pl.program_id(0)
    base = t * tok_block
    h = o_ref.shape[1]

    def _row(i):
        rel = ids_ref[base + i] - vocab_start
        valid = jnp.logical_and(rel >= 0, rel < vp)
        # Out-of-shard / padded tokens fetch row 0 (cheap, always legal) and are zeroed below.
        return jnp.where(valid, rel, 0), valid

    # 1) Issue all row DMAs for this tile (all in flight on one shared DMA semaphore, same
    #    byte count each), writing straight into the lane-dense output tile.
    def _issue(i, carry):
        row, _ = _row(i)
        pltpu.make_async_copy(w_hbm.at[pl.ds(row, 1), :],
                              o_ref.at[pl.ds(i, 1), :],
                              sem.at[0]).start()
        return carry

    lax.fori_loop(0, tok_block, _issue, 0)

    # 2) Wait for all of them (copies are identically sized, so waits are interchangeable).
    def _wait(i, carry):
        pltpu.make_async_copy(w_hbm.at[pl.ds(0, 1), :],
                              o_ref.at[pl.ds(i, 1), :],
                              sem.at[0]).wait()
        return carry

    lax.fori_loop(0, tok_block, _wait, 0)

    # 3) Vocab-parallel masking: zero rows whose token id falls outside this shard.
    #    (All DMAs are complete here, so the zero store cannot be overwritten.)
    def _mask(i, carry):
        _, valid = _row(i)

        @pl.when(jnp.logical_not(valid))
        def _():
            o_ref[pl.ds(i, 1), :] = jnp.zeros((1, h), o_ref.dtype)

        return carry

    lax.fori_loop(0, tok_block, _mask, 0)


def vocab_parallel_embedding_lora(ids: jax.Array,
                                  weight: jax.Array,
                                  vocab_start: int = 0,
                                  *,
                                  tok_block: int = 256) -> jax.Array:
    """Forward pass of VocabParallelEmbedding(WithLoRA), one vocab shard.

    ids:    int32  [B, S]                (global token ids)
    weight: float  [V_per_partition, H]  (this shard's rows)
    returns float  [B, S, H]             (zeros for out-of-shard tokens)
    """
    B, S = ids.shape
    Vp, H = weight.shape
    n_tok = B * S

    # Shrink the token tile for tiny inputs; keep it a sublane multiple.
    tok_block = max(8, min(tok_block, _round_up(n_tok, 8)))
    num_tiles = pl.cdiv(n_tok, tok_block)
    if num_tiles > 1 and num_tiles % 2 == 1:
        num_tiles += 1  # keep the megacore-'parallel' token axis even (v7x: 2 TCs)
    n_tok_pad = num_tiles * tok_block

    # Flatten tokens; pad with an in-shard id (row 0) — padded rows are sliced off afterwards.
    flat_ids = ids.reshape(n_tok).astype(jnp.int32)
    if n_tok_pad != n_tok:
        flat_ids = jnp.pad(flat_ids, (0, n_tok_pad - n_tok), constant_values=vocab_start)

    kernel = functools.partial(_gather_kernel,
                               vocab_start=vocab_start, vp=Vp, tok_block=tok_block)

    dtype_bytes = jnp.dtype(weight.dtype).itemsize
    tile_bytes = tok_block * H * dtype_bytes
    # Double-buffered output tile + headroom; never below the 32 MiB scoped default.
    vmem_limit = min(max(32 * 1024 * 1024, 3 * tile_bytes + (1 << 20)), 100 * 1024 * 1024)

    out_flat = pl.pallas_call(
        kernel,
        out_shape=jax.ShapeDtypeStruct((n_tok_pad, H), weight.dtype),
        grid_spec=pltpu.PrefetchScalarGridSpec(
            num_scalar_prefetch=1,                       # flat token ids -> SMEM
            grid=(num_tiles,),
            in_specs=[pl.BlockSpec(memory_space=pl.ANY)],  # weight stays in HBM; manual DMA
            out_specs=pl.BlockSpec((tok_block, H), lambda t, ids: (t, 0)),
            scratch_shapes=[pltpu.SemaphoreType.DMA((1,))],
        ),
        compiler_params=pltpu.CompilerParams(
            dimension_semantics=("parallel",),
            vmem_limit_bytes=vmem_limit),
        cost_estimate=pl.CostEstimate(
            flops=0,
            transcendentals=0,
            bytes_accessed=2 * n_tok_pad * H * dtype_bytes + n_tok_pad * 4),
    )(flat_ids, weight)

    if n_tok_pad != n_tok:
        out_flat = out_flat[:n_tok]
    return out_flat.reshape(B, S, H)


if __name__ == "__main__":
    key = jax.random.PRNGKey(0)
    k_w, k_ids, k_ids2 = jax.random.split(key, 3)

    B, S = 2, 8          # batch, sequence
    V, H = 64, 128       # per-partition vocab size, hidden dim

    weight = jax.random.normal(k_w, (V, H), dtype=jnp.float32)

    # --- tp=1 case: every id is in-shard -> plain embedding lookup -------------------------
    ids = jax.random.randint(k_ids, (B, S), 0, V, dtype=jnp.int32)
    out = vocab_parallel_embedding_lora(ids, weight)
    out = jax.block_until_ready(out)
    ref = jnp.take(weight, ids, axis=0)
    assert out.shape == (B, S, H), out.shape
    assert jnp.allclose(out, ref, atol=1e-5, rtol=1e-5), "mismatch vs reference (tp=1)"

    # --- sharded case: this shard owns global ids [32, 32+V); others must come out zero ----
    vocab_start = 32
    ids2 = jax.random.randint(k_ids2, (B, S), 0, vocab_start + V + 32, dtype=jnp.int32)
    out2 = vocab_parallel_embedding_lora(ids2, weight, vocab_start)
    out2 = jax.block_until_ready(out2)
    in_shard = (ids2 >= vocab_start) & (ids2 < vocab_start + V)
    rows = jnp.take(weight, jnp.clip(ids2 - vocab_start, 0, V - 1), axis=0)
    ref2 = jnp.where(in_shard[..., None], rows, 0.0)
    assert jnp.allclose(out2, ref2, atol=1e-5, rtol=1e-5), "mismatch vs reference (sharded)"

    print("KERNEL_OK")
</pallas_src>

<mosaic_0001>
module attributes {stable_mosaic.version = 11 : i64} {
  func.func @_gather_kernel(%arg0: i32, %arg1: memref<16xi32, #tpu.memory_space<smem>>, %arg2: memref<64x128xf32, #tpu.memory_space<any>>, %arg3: memref<16x128xf32, #tpu.memory_space<vmem>>, %arg4: memref<1x!tpu.dma_semaphore, #tpu.memory_space<semaphore_mem>>) attributes {dimension_semantics = [#tpu.dimension_semantics<parallel>], iteration_bounds = array<i64: 1>, scalar_prefetch = 1 : i64, scratch_operands = 1 : i64, tpu.core_type = #tpu.core_type<tc>, window_params = [{}, {transform_indices = @transform_1, window_bounds = array<i64: 16, 128>}]} {
    %c16_i32 = arith.constant 16 : i32
    %0 = arith.muli %arg0, %c16_i32 : i32
    %c0_i32 = arith.constant 0 : i32
    %c16_i32_0 = arith.constant 16 : i32
    %1 = arith.addi %c0_i32, %c16_i32_0 : i32
    %c1_i32 = arith.constant 1 : i32
    scf.for %arg5 = %c0_i32 to %1 step %c1_i32  : i32 {
      %4 = arith.addi %0, %arg5 : i32
      %5 = arith.index_cast %4 : i32 to index
      %6 = memref.load %arg1[%5] : memref<16xi32, #tpu.memory_space<smem>>
      %c0_i32_10 = arith.constant 0 : i32
      %7 = arith.subi %6, %c0_i32_10 : i32
      %c0_i32_11 = arith.constant 0 : i32
      %8 = arith.cmpi sge, %7, %c0_i32_11 : i32
      %c64_i32 = arith.constant 64 : i32
      %9 = arith.cmpi slt, %7, %c64_i32 : i32
      %10 = arith.andi %8, %9 : i1
      %c0_i32_12 = arith.constant 0 : i32
      %11 = arith.select %10, %7, %c0_i32_12 : i32
      %c0_i32_13 = arith.constant 0 : i32
      %c0_i32_14 = arith.constant 0 : i32
      %12 = tpu.memref_slice %arg2[%11, %c0_i32_14] : memref<64x128xf32, #tpu.memory_space<any>> -> memref<1x128xf32, #tpu.memory_space<any>>
      %c0_i32_15 = arith.constant 0 : i32
      %13 = tpu.memref_slice %arg3[%arg5, %c0_i32_15] : memref<16x128xf32, #tpu.memory_space<vmem>> -> memref<1x128xf32, #tpu.memory_space<vmem>>
      %14 = tpu.memref_slice %arg4[%c0_i32_13] : memref<1x!tpu.dma_semaphore, #tpu.memory_space<semaphore_mem>> -> memref<1x!tpu.dma_semaphore, #tpu.memory_space<semaphore_mem>>
      %15 = tpu.memref_squeeze %14 : memref<1x!tpu.dma_semaphore, #tpu.memory_space<semaphore_mem>> -> memref<!tpu.dma_semaphore, #tpu.memory_space<semaphore_mem>>
      tpu.enqueue_dma source(%12 : memref<1x128xf32, #tpu.memory_space<any>>) target(%13 : memref<1x128xf32, #tpu.memory_space<vmem>>) target_semaphore(%15 : memref<!tpu.dma_semaphore, #tpu.memory_space<semaphore_mem>>)
    }
    %c16_i32_1 = arith.constant 16 : i32
    %c0_i32_2 = arith.constant 0 : i32
    %c16_i32_3 = arith.constant 16 : i32
    %2 = arith.addi %c0_i32_2, %c16_i32_3 : i32
    %c1_i32_4 = arith.constant 1 : i32
    scf.for %arg5 = %c0_i32_2 to %2 step %c1_i32_4  : i32 {
      %c0_i32_10 = arith.constant 0 : i32
      %c0_i32_11 = arith.constant 0 : i32
      %c0_i32_12 = arith.constant 0 : i32
      %4 = tpu.memref_slice %arg2[%c0_i32_11, %c0_i32_12] : memref<64x128xf32, #tpu.memory_space<any>> -> memref<1x128xf32, #tpu.memory_space<any>>
      %c0_i32_13 = arith.constant 0 : i32
      %5 = tpu.memref_slice %arg3[%arg5, %c0_i32_13] : memref<16x128xf32, #tpu.memory_space<vmem>> -> memref<1x128xf32, #tpu.memory_space<vmem>>
      %6 = tpu.memref_slice %arg4[%c0_i32_10] : memref<1x!tpu.dma_semaphore, #tpu.memory_space<semaphore_mem>> -> memref<1x!tpu.dma_semaphore, #tpu.memory_space<semaphore_mem>>
      %7 = tpu.memref_squeeze %6 : memref<1x!tpu.dma_semaphore, #tpu.memory_space<semaphore_mem>> -> memref<!tpu.dma_semaphore, #tpu.memory_space<semaphore_mem>>
      tpu.wait_dma2 semaphore(%7 : memref<!tpu.dma_semaphore, #tpu.memory_space<semaphore_mem>>) src(%4 : memref<1x128xf32, #tpu.memory_space<any>>) dst(%5 : memref<1x128xf32, #tpu.memory_space<vmem>>)
    }
    %c16_i32_5 = arith.constant 16 : i32
    %c0_i32_6 = arith.constant 0 : i32
    %c16_i32_7 = arith.constant 16 : i32
    %3 = arith.addi %c0_i32_6, %c16_i32_7 : i32
    %c1_i32_8 = arith.constant 1 : i32
    scf.for %arg5 = %c0_i32_6 to %3 step %c1_i32_8  : i32 {
      %4 = arith.addi %0, %arg5 : i32
      %5 = arith.index_cast %4 : i32 to index
      %6 = memref.load %arg1[%5] : memref<16xi32, #tpu.memory_space<smem>>
      %c0_i32_10 = arith.constant 0 : i32
      %7 = arith.subi %6, %c0_i32_10 : i32
      %c0_i32_11 = arith.constant 0 : i32
      %8 = arith.cmpi sge, %7, %c0_i32_11 : i32
      %c64_i32 = arith.constant 64 : i32
      %9 = arith.cmpi slt, %7, %c64_i32 : i32
      %10 = arith.andi %8, %9 : i1
      %true = arith.constant true
      %11 = arith.xori %10, %true : i1
      %12 = arith.extui %11 : i1 to i32
      %c0_i32_12 = arith.constant 0 : i32
      %13 = arith.cmpi ne, %12, %c0_i32_12 : i32
      scf.if %13 {
        %cst = arith.constant 0.000000e+00 : f32
        %14 = vector.broadcast %cst : f32 to vector<1x128xf32>
        %15 = arith.index_cast %arg5 : i32 to index
        %c0 = arith.constant 0 : index
        %16 = vector.load %arg3[%15, %c0] : memref<16x128xf32, #tpu.memory_space<vmem>>, vector<1x128xf32>
        tpu.vector_store %arg3[%15, %c0], %14 {strides = array<i32>} : memref<16x128xf32, #tpu.memory_space<vmem>>, vector<1x128xf32>,
      } else {
      }
    }
    %c16_i32_9 = arith.constant 16 : i32
    return
  }
  func.func @transform_1(%arg0: i32, %arg1: memref<16xi32, #tpu.memory_space<smem>>) -> (i32, i32) {
    %c0_i32 = arith.constant 0 : i32
    %c0_i32_0 = arith.constant 0 : i32
    return %arg0, %c0_i32 : i32, i32
  }
}

</mosaic_0001>

<bundles_post_ra>
// kernel: tpu_custom_call.1
= control target key start
LH: loop header
LB: loop body
LE: loop exit
PB: predicated region body
PF: predicated region fallthrough
CT: control target
= control target key end

     0   :  { %s302_s0 = inlined_call_operand.hbm [shape: s32[16], index: 0, kind: input, shape index: {}]   ;;  %s303_s1 = inlined_call_operand.hbm [shape: f32[64,128], index: 1, kind: input, shape index: {}]   ;;  %s304_s2 = inlined_call_operand.hbm [shape: f32[16,128], index: 2, kind: output, shape index: {}]  }
   0x1   :  { %s139_s11 = scalar_lea.hbm %s302_s0, 16 }
   0x2   :  { %p140_p0 = scmp.ne.s32.totalorder %s302_s0, %s139_s11  ;;  %p143_p1 = scmp.lt.u32.totalorder %s139_s11, %s302_s0 }
   0x4   :  { %p145_p2 = pnand %p143_p1, %p140_p0 }
   0x6   :  { %148 = shalt.err (!%p145_p2)  }
   0x7   :  { %s225_s16 = smov [#allocation4]  }
   0x8   :  { %8 = dma.hbm_to_smem %s302_s0, 16, %s225_s16, [#allocation3] }
   0x9   :  { %207 = dma.done.wait [#allocation3], 16 }
   0xa   :  { %208 = vsyncadd [#allocation3], 4294967280 }
   0xb   :  { %10 = sfence }
   0xc   :  { %11 = vsyncpa [#allocation6], 0  ;;  %s257_s19 = smov 0  }
   0xd LB: > { %s20_s20 = sld [smem:[#allocation4 + %s215_s19]]  ;;  %s28_s21 = scalar_lea.vmem [#allocation5], %s215_s19  ;;  %s215_s19 = sphi %s257_s19, %s18_s19  }
   0xe   : > { %s36_s22 = sshll.u32 %s28_s21, 4  ;;  %s151_s29 = scalar_lea.hbm %s303_s1, 1024  ;;  %s37_s22 = int_to_ptr.vmem [resolvable:$true] %s36_s22 }
  0x13   : > { %p21_p3 = scmp.ge.s32.totalorder %s20_s20, 0  ;;  %p22_p4 = scmp.lt.s32.totalorder %s20_s20, 64 }
  0x15   : > { %p23_p5 = pnand %p22_p4, %p21_p3 }
  0x17   : > { %s306_s20 = smov (%p23_p5, %s20_s20), 0 }
  0x18   : > { %s108_s0 = sshll.u32 %s306_s20, 4 }
  0x19   : > { %s27_s25 = scalar_lea.hbm %s303_s1, %s108_s0 }
  0x1a   : > { %s149_s26 = scalar_lea.hbm %s27_s25, 16  ;;  %p152_p7 = scmp.lt.u32.totalorder %s27_s25, %s303_s1 }
  0x1b   : > { %p150_p6 = scmp.ne.s32.totalorder %s27_s25, %s149_s26  ;;  %p153_p8 = scmp.lt.u32.totalorder %s151_s29, %s149_s26 }
  0x1c   : > { %p155_p10 = scmp.lt.u32.totalorder %s149_s26, %s27_s25 }
  0x1d   : > { %p154_p9 = por %p153_p8, %p152_p7 }
  0x1f   : > { %p156_p11 = por %p155_p10, %p154_p9 }
  0x21   : > { %p157_p12 = pnand %p156_p11, %p150_p6 }
  0x23   : > { %160 = shalt.err (!%p157_p12)  }
  0x24   : > { %s161_s4 = scalar_lea.vmem %s37_s22, 16  ;;  %s226_s5 = smov [#allocation5]  }
  0x25   : > { %p162_p13 = scmp.ne.s32.totalorder %s37_s22, %s161_s4  ;;  %s163_s6 = sshll.u32 %s226_s5, 4  ;;  %s273_s6 = int_to_ptr.vmem [resolvable:$false] %s163_s6 }
  0x26   : > { %s276_s7 = scalar_lea.vmem %s273_s6, 256  ;;  %p166_p0 = scmp.lt.s32.totalorder %s37_s22, %s273_s6 }
  0x27   : > { %p167_p1 = scmp.lt.s32.totalorder %s276_s7, %s161_s4 }
  0x29   : > { %p168_p2 = por %p167_p1, %p166_p0 }
  0x2b   : > { %p169_p3 = pnand %p168_p2, %p162_p13 }
  0x2d   : > { %172 = shalt.err (!%p169_p3)  }
  0x2e   : > { %39 = dma.hbm_to_vmem [thread:$0]  %s27_s25, 16, %s37_s22, [#allocation2] }
  0x2f   : > { %s18_s19 = sadd.s32 1, %s215_s19  }
  0x30   : > { %p15_p4 = scmp.ge.s32.totalorder %s18_s19, 16  }
  0x31   :  { %s217_s8 = smov (%p15_p4), 0  }
  0x32   :  { %17 = sbr.rel (!%p15_p4) target bundleno = 13 (0xd), region = 52 }
  0x39 LB: > { %209 = dma.done.wait [#allocation2], 16  ;;  %s219_s8 = sphi %s217_s8, %s45_s8  }
  0x3a   : > { %210 = vsyncadd [#allocation2], 4294967280  ;;  %s45_s8 = sadd.s32 1, %s219_s8  }
  0x3b   : > { %p42_p5 = scmp.ge.s32.totalorder %s45_s8, 16  }
  0x3c   :  { %s221_s9 = smov (%p42_p5), 0  }
  0x3d   :  { %44 = sbr.rel (!%p42_p5) target bundleno = 57 (0x39), region = 63 }
  0x44 LB: > { %s56_s10 = sld [smem:[#allocation4 + %s223_s9]]  ;;  %s223_s9 = sphi %s221_s9, %s54_s9  }
  0x4a   : > { %p57_p6 = scmp.ge.s32.totalorder %s56_s10, 0  ;;  %p58_p7 = scmp.lt.s32.totalorder %s56_s10, 64 }
  0x4c   : > { %p59_p8 = pnand %p58_p7, %p57_p6 }
  0x4d   : > { %s64_s11 = scalar_lea.vmem (%p59_p8), [#allocation5], %s223_s9  ;;  %v227_v0 = vmov (%p59_p8), 0.0  }
  0x4e   : > { %63 = sbr.rel (!%p59_p8) target bundleno = 85 (0x55), region = 30  ;;  %65 = vst [vmem:[%s64_s11] sm:$0x1] (%p59_p8), %v227_v0 }
  0x55 PF: > { %s54_s9 = sadd.s32 1, %s223_s9  }
  0x56   : > { %p51_p9 = scmp.ge.s32.totalorder %s54_s9, 16  }
  0x57   :  { %p174_p10 = scmp.ne.s32.totalorder (%p51_p9), %s273_s6, %s276_s7  ;;  %p178_p11 = scmp.lt.s32.totalorder (%p51_p9), %s273_s6, %s273_s6 }
  0x58   :  { %53 = sbr.rel (!%p51_p9) target bundleno = 68 (0x44), region = 74  ;;  %p179_p12 = scmp.lt.s32.totalorder (%p51_p9), %s276_s7, %s276_s7 }
  0x5a   :  { %p180_p13 = por (%p51_p9), %p179_p12, %p178_p11 }
  0x5c   :  { %p181_p0 = pnand (%p51_p9), %p180_p13, %p174_p10 }
  0x5f   :  { %184 = shalt.err (!%p181_p0)
}
  0x60   :  { %s185_s13 = scalar_lea.hbm %s304_s2, 256 }
  0x61   :  { %p186_p1 = scmp.ne.s32.totalorder %s304_s2, %s185_s13  ;;  %p189_p2 = scmp.lt.u32.totalorder %s185_s13, %s304_s2 }
  0x63   :  { %p191_p3 = pnand %p189_p2, %p186_p1 }
  0x65   :  { %194 = shalt.err (!%p191_p3)
}
  0x66   :  { %s228_s18 = smov 128   ;;  %s229_s19 = smov 8  }
  0x67   :  { %77 = dma.vmem_to_hbm [thread:$0]  %s273_s6, 256, %s304_s2, [#allocation6], %s228_s18, %s228_s18, %s229_s19  }
  0x68   :  { %211 = dma.done.wait [#allocation6], 256  }
  0x69   :  { %212 = vsyncadd [#allocation6], 4294967040 }
  0x6a   :  { %81 = vsyncpa [#allocation6], 1 }
  0x6b   :  { %82 = vsyncmov [#allocation2] }
  0x6e   :  { %s83_s22 = vpop.sfrf %82 }
  0x6f   :  { %p109_p4 = scmp.ne.s32.totalorder %s83_s22, 0 }
  0x71   :  { %87 = shalt.err (%p109_p4)  }

</bundles_post_ra>
